<compile_context>
chip_gen: v7x
topology: tpu7x:2x2x1
jax: 0.10.0
libtpu: 0.0.40
codegen_flags: <defaults>
</compile_context>

<pallas_src>
import functools

import jax
import jax.numpy as jnp
from jax import lax
from jax.experimental import pallas as pl
from jax.experimental.pallas import tpu as pltpu


def _round_up(x, m):
    return ((x + m - 1) // m) * m


def _kl_div_kernel(p_ref, t_ref, o_ref, *, total_rows, block_rows,
                   total_cols, block_cols):
    """Accumulates sum(t * log(t / p)) over this (rows, cols) tile into the
    (8, 128) f32 slab owned by the current batch block (value at [0, 0])."""
    i = pl.program_id(0)               # batch-block index ("parallel")
    k = pl.program_id(1)               # class-block index ("arbitrary", last)
    nb = pl.num_programs(0)
    nc = pl.num_programs(1)

    p = p_ref[...]                     # (tb, tc) predictions (probabilities)
    t = t_ref[...]                     # (tb, tc) targets
    tb, tc = p.shape

    # Output slab stays resident across the class (k) axis: zero it once.
    @pl.when(k == 0)
    def _init():
        o_ref[...] = jnp.zeros_like(o_ref)

    def _accumulate(elt):
        # Scalar block-sum; XLU/VPU cost is negligible vs. the HBM stream.
        s = jnp.sum(elt)
        r = lax.broadcasted_iota(jnp.int32, (8, 128), 0)
        c = lax.broadcasted_iota(jnp.int32, (8, 128), 1)
        o_ref[...] += jnp.where((r == 0) & (c == 0), s, 0.0).astype(jnp.float32)

    def _unmasked():
        # Single EUP log per element: t * log(t / p) == t * (log t - log p).
        # NOTE: matches the reference CUDA kernel exactly, including
        # t == 0 -> 0 * log(0) = NaN (no xlogy special-casing).
        _accumulate(t * jnp.log(t / p))

    has_row_tail = (total_rows % block_rows) != 0
    has_col_tail = (total_cols % block_cols) != 0

    if not (has_row_tail or has_col_tail):
        _unmasked()
    else:
        # Gate mask cost to the tail blocks only; full blocks take the cheap path.
        if has_row_tail and has_col_tail:
            is_tail = jnp.logical_or(i == nb - 1, k == nc - 1)
        elif has_row_tail:
            is_tail = i == nb - 1
        else:
            is_tail = k == nc - 1

        @pl.when(jnp.logical_not(is_tail))
        def _full():
            _unmasked()

        @pl.when(is_tail)
        def _tail():
            valid = None
            if has_row_tail:
                row_ids = lax.broadcasted_iota(jnp.int32, (tb, tc), 0)
                valid = row_ids < (jnp.int32(total_rows)
                                   - i * jnp.int32(block_rows))
            if has_col_tail:
                col_ids = lax.broadcasted_iota(jnp.int32, (tb, tc), 1)
                col_ok = col_ids < (jnp.int32(total_cols)
                                    - k * jnp.int32(block_cols))
                valid = col_ok if valid is None else jnp.logical_and(valid, col_ok)
            # Select BEFORE the log so padded-row/col garbage never reaches it.
            ratio = jnp.where(valid, t / p, 1.0)       # log(1) == 0 on padding
            _accumulate(jnp.where(valid, t, 0.0) * jnp.log(ratio))


def kl_div_pallas(predictions, targets, *, target_tile_bytes=2 * 1024 * 1024):
    """predictions, targets: (B, C) float32 probabilities. Returns scalar f32.

    Matches the reference module: log(predictions) is fused into the kernel,
    result is sum over classes, mean over batch ("batchmean")."""
    predictions = jnp.asarray(predictions, jnp.float32)
    targets = jnp.asarray(targets, jnp.float32)
    B, C = predictions.shape
    assert targets.shape == (B, C)

    itemsize = 4
    bytes_per_row = C * itemsize

    if B < 8:
        # Tiny batch: sublane block equal to the full batch dim (legal).
        block_rows = B
        if B * bytes_per_row <= target_tile_bytes:
            block_cols = C
        else:
            cols = max(128, (target_tile_bytes // (B * itemsize)) // 128 * 128)
            block_cols = min(cols, _round_up(C, 128))
    elif 8 * bytes_per_row <= target_tile_bytes:
        # Common case: full-C rows fit the tile budget; tile over batch only.
        block_cols = C
        rows = (target_tile_bytes // bytes_per_row) // 8 * 8        # >= 8
        # Cap so the grid has >= ~4 steps: keeps the double-buffer pipeline
        # busy and gives v7x's 2 TensorCores something to shard.
        cap = max(8, _round_up(pl.cdiv(B, 4), 8))
        block_rows = min(rows, cap, _round_up(B, 8))
    else:
        # Huge C: tile the class axis too (reduction axis, last, "arbitrary"),
        # keeping every tile near the ~2 MiB streaming sweet spot and well
        # inside v7x's smaller VMEM.
        block_rows = 8
        cols = max(128, (target_tile_bytes // (8 * itemsize)) // 128 * 128)
        block_cols = min(cols, _round_up(C, 128))

    num_b_blocks = pl.cdiv(B, block_rows)
    num_c_blocks = pl.cdiv(C, block_cols)

    kernel = functools.partial(
        _kl_div_kernel,
        total_rows=B, block_rows=block_rows,
        total_cols=C, block_cols=block_cols)

    partials = pl.pallas_call(
        kernel,
        out_shape=jax.ShapeDtypeStruct((num_b_blocks * 8, 128), jnp.float32),
        grid_spec=pltpu.PrefetchScalarGridSpec(
            num_scalar_prefetch=0,
            grid=(num_b_blocks, num_c_blocks),
            in_specs=[
                pl.BlockSpec((block_rows, block_cols), lambda i, k: (i, k)),
                pl.BlockSpec((block_rows, block_cols), lambda i, k: (i, k)),
            ],
            # One lane-dense (8, 128) slab per batch block; revisited across
            # the class axis (accumulator) -> that axis is "arbitrary".
            out_specs=pl.BlockSpec((8, 128), lambda i, k: (i, 0)),
        ),
        compiler_params=pltpu.CompilerParams(
            dimension_semantics=("parallel", "arbitrary"),
        ),
    )(predictions, targets)

    # Tiny epilogue: num_b_blocks x 4 KiB -> scalar, then batch-mean.
    return jnp.sum(partials) / jnp.float32(B)


def kl_div_reference(predictions, targets):
    log_p = jnp.log(predictions)
    elt = targets * (jnp.log(targets) - log_p)
    return jnp.mean(jnp.sum(elt, axis=1))


if __name__ == "__main__":
    key = jax.random.PRNGKey(0)
    ks = jax.random.split(key, 6)

    def softmax_pair(k1, k2, shape):
        p = jax.nn.softmax(jax.random.normal(k1, shape, jnp.float32), axis=-1)
        t = jax.nn.softmax(jax.random.normal(k2, shape, jnp.float32), axis=-1)
        return p, t

    # 1) Small (batch, num_classes) shape; grid has >= 2 steps.
    p1, t1 = softmax_pair(ks[0], ks[1], (16, 256))
    out1 = jax.block_until_ready(kl_div_pallas(p1, t1))
    ref1 = kl_div_reference(p1, t1)
    assert jnp.allclose(out1, ref1, rtol=1e-5, atol=1e-5), (out1, ref1)

    # 2) Ragged batch AND ragged classes with forced class tiling: exercises
    #    the tail-only mask path and the class-axis accumulation.
    p2, t2 = softmax_pair(ks[2], ks[3], (20, 700))
    out2 = jax.block_until_ready(
        kl_div_pallas(p2, t2, target_tile_bytes=16 * 1024))
    ref2 = kl_div_reference(p2, t2)
    assert jnp.allclose(out2, ref2, rtol=1e-5, atol=1e-5), (out2, ref2)

    # 3) Tiny batch (< 8 rows): full-dim sublane block path.
    p3, t3 = softmax_pair(ks[4], ks[5], (4, 128))
    out3 = jax.block_until_ready(kl_div_pallas(p3, t3))
    ref3 = kl_div_reference(p3, t3)
    assert jnp.allclose(out3, ref3, rtol=1e-5, atol=1e-5), (out3, ref3)

    print("KERNEL_OK")
</pallas_src>

<mosaic_0001>
module attributes {stable_mosaic.version = 11 : i64} {
  func.func @_kl_div_kernel(%arg0: i32, %arg1: i32, %arg2: memref<8x256xf32, #tpu.memory_space<vmem>>, %arg3: memref<8x256xf32, #tpu.memory_space<vmem>>, %arg4: memref<8x128xf32, #tpu.memory_space<vmem>>) attributes {dimension_semantics = [#tpu.dimension_semantics<parallel>, #tpu.dimension_semantics<arbitrary>], iteration_bounds = array<i64: 2, 1>, scalar_prefetch = 0 : i64, scratch_operands = 0 : i64, tpu.core_type = #tpu.core_type<tc>, window_params = [{transform_indices = @transform_0, window_bounds = array<i64: 8, 256>}, {transform_indices = @transform_1, window_bounds = array<i64: 8, 256>}, {transform_indices = @transform_2, window_bounds = array<i64: 8, 128>}]} {
    %c0 = arith.constant 0 : index
    %c0_0 = arith.constant 0 : index
    %0 = vector.load %arg2[%c0, %c0_0] : memref<8x256xf32, #tpu.memory_space<vmem>>, vector<8x256xf32>
    %c0_1 = arith.constant 0 : index
    %c0_2 = arith.constant 0 : index
    %1 = vector.load %arg3[%c0_1, %c0_2] : memref<8x256xf32, #tpu.memory_space<vmem>>, vector<8x256xf32>
    %c0_i32 = arith.constant 0 : i32
    %2 = arith.cmpi eq, %arg1, %c0_i32 : i32
    %3 = arith.extui %2 : i1 to i32
    %c0_i32_3 = arith.constant 0 : i32
    %4 = arith.cmpi ne, %3, %c0_i32_3 : i32
    scf.if %4 {
      %cst_11 = arith.constant 0.000000e+00 : f32
      %25 = vector.broadcast %cst_11 : f32 to vector<8x128xf32>
      %c0_12 = arith.constant 0 : index
      %c0_13 = arith.constant 0 : index
      %26 = vector.load %arg4[%c0_12, %c0_13] : memref<8x128xf32, #tpu.memory_space<vmem>>, vector<8x128xf32>
      tpu.vector_store %arg4[%c0_12, %c0_13], %25 {strides = array<i32>} : memref<8x128xf32, #tpu.memory_space<vmem>>, vector<8x128xf32>,
    } else {
    }
    %5 = arith.divf %1, %0 : vector<8x256xf32>
    %6 = math.log %5 : vector<8x256xf32>
    %7 = arith.mulf %1, %6 : vector<8x256xf32>
    %8 = vector.shape_cast %7 : vector<8x256xf32> to vector<1x8x256xf32>
    %cst = arith.constant dense<0.000000e+00> : vector<1xf32>
    %9 = vector.multi_reduction <add>, %8, %cst [1, 2] : vector<1x8x256xf32> to vector<1xf32>
    %10 = vector.shape_cast %9 : vector<1xf32> to vector<1x1x1xf32>
    %11 = vector.extract %10[0, 0, 0] : f32 from vector<1x1x1xf32>
    %12 = tpu.iota {dimensions = array<i32: 0>} : vector<8x128xi32>
    %13 = tpu.iota {dimensions = array<i32: 1>} : vector<8x128xi32>
    %c0_4 = arith.constant 0 : index
    %c0_5 = arith.constant 0 : index
    %14 = vector.load %arg4[%c0_4, %c0_5] : memref<8x128xf32, #tpu.memory_space<vmem>>, vector<8x128xf32>
    %c0_i32_6 = arith.constant 0 : i32
    %15 = vector.broadcast %c0_i32_6 : i32 to vector<8x128xi32>
    %16 = arith.cmpi eq, %12, %15 : vector<8x128xi32>
    %c0_i32_7 = arith.constant 0 : i32
    %17 = vector.broadcast %c0_i32_7 : i32 to vector<8x128xi32>
    %18 = arith.cmpi eq, %13, %17 : vector<8x128xi32>
    %19 = arith.andi %16, %18 : vector<8x128xi1>
    %cst_8 = arith.constant 0.000000e+00 : f32
    %20 = vector.broadcast %11 : f32 to vector<8x128xf32>
    %21 = vector.broadcast %cst_8 : f32 to vector<8x128xf32>
    %22 = arith.select %19, %20, %21 : vector<8x128xi1>, vector<8x128xf32>
    %23 = arith.addf %14, %22 : vector<8x128xf32>
    %c0_9 = arith.constant 0 : index
    %c0_10 = arith.constant 0 : index
    %24 = vector.load %arg4[%c0_9, %c0_10] : memref<8x128xf32, #tpu.memory_space<vmem>>, vector<8x128xf32>
    tpu.vector_store %arg4[%c0_9, %c0_10], %23 {strides = array<i32>} : memref<8x128xf32, #tpu.memory_space<vmem>>, vector<8x128xf32>,
    return
  }
  func.func @transform_0(%arg0: i32, %arg1: i32) -> (i32, i32) {
    %c0_i32 = arith.constant 0 : i32
    return %arg0, %arg1 : i32, i32
  }
  func.func @transform_1(%arg0: i32, %arg1: i32) -> (i32, i32) {
    %c0_i32 = arith.constant 0 : i32
    return %arg0, %arg1 : i32, i32
  }
  func.func @transform_2(%arg0: i32, %arg1: i32) -> (i32, i32) {
    %c0_i32 = arith.constant 0 : i32
    %c0_i32_0 = arith.constant 0 : i32
    return %arg0, %c0_i32 : i32, i32
  }
}

</mosaic_0001>

<bundles_post_ra>
// kernel: tpu_custom_call.1
= control target key start
LH: loop header
LB: loop body
LE: loop exit
PB: predicated region body
PF: predicated region fallthrough
CT: control target
= control target key end

     0   :  { %7 = vsyncpa [#allocation3], 0  ;;  %s867_s0 = inlined_call_operand.hbm [shape: f32[16,256], index: 0, kind: input, shape index: {}]   ;;  %s868_s1 = inlined_call_operand.hbm [shape: f32[16,256], index: 1, kind: input, shape index: {}]   ;;  %s869_s2 = inlined_call_operand.hbm [shape: f32[16,128], index: 2, kind: output, shape index: {}]  }
   0x1   :  { %9 = vsyncpa [#allocation3 + $0x1], 0 }
   0x2   :  { %10 = vsyncpa [#allocation6], 0 }
   0x3   :  { %12 = vsyncpa [#allocation6 + $0x1], 0 }
   0x4   :  { %13 = vsyncpa [#allocation4], 0 }
   0x5   :  { %15 = vsyncpa [#allocation4 + $0x1], 0  ;;  %s646_s9 = smov 0   ;;  %s648_s10 = smov 0  }
   0x6   :  { %s650_s11 = smov 0   ;;  %s652_s12 = smov 0  }
   0x7   :  { %s654_s13 = smov 0   ;;  %s656_s14 = smov 0  }
   0x8 LB: > { %s382_s15 = sadd.s32 4294967295, %s626_s14   ;;  %s383_s16 = sadd.s32 4294967294, %s626_s14   ;;  %s626_s14 = sphi %s656_s14, %s21_s14   ;;  %s622_s13 = sphi %s654_s13, %s889_s13   ;;  %s618_s12 = sphi %s652_s12, %s888_s12   ;;  %s614_s11 = sphi %s650_s11, %s887_s11   ;;  %s610_s10 = sphi %s648_s10, %s886_s10   ;;  %s606_s9 = sphi %s646_s9, %s885_s9  }
   0x9   : > { %s33_s17 = sadd.s32 1, %s622_s13  ;;  %s42_s18 = sadd.s32 1, %s614_s11 }
   0xa   : > { %p35_p0 = scmp.ge.s32.totalorder %s33_s17, 2  ;;  %p49_p1 = scmp.ne.s32.totalorder %s614_s11, %s610_s10 }
   0xb   : > { %p50_p2 = scmp.eq.s32.totalorder %s626_s14, 0  ;;  %p55_p3 = scmp.ne.s32.totalorder %s610_s10, %s606_s9 }
   0xc   : > { %s891_s17 = smov (%p35_p0, %s33_s17), 0  ;;  %p56_p5 = scmp.eq.s32.totalorder %s382_s15, 0 }
   0xd   : > { %p687_p4 = por %p50_p2, %p49_p1  ;;  %s37_s20 = ssub.s32 %s622_s13, %s891_s17 }
   0xe   : > { %p107_p6 = scmp.eq.s32.totalorder %s382_s15, 1  ;;  %p40_p7 = scmp.eq.s32.totalorder %s37_s20, 0 }
   0xf   : > { %p693_p8 = por %p56_p5, %p55_p3  ;;  %p113_p10 = scmp.eq.s32.totalorder %s383_s16, 1 }
  0x10   : > { %p697_p9 = por %p107_p6, %p49_p1  ;;  %p421_p13 = scmp.lt.s32.totalorder %s626_s14, 2 }
  0x11   : > { %s873_s21 = scalar_select %p693_p8, 1, 0 }
  0x12   : > { %s874_s22 = scalar_select %p697_p9, 1, 0 }
  0x13   : > { %s702_s23 = scalar_select %p40_p7, %s614_s11, %s42_s18  }
  0x14   : > { %p704_p11 = por %p113_p10, %p55_p3  ;;  %s711_s25 = sand.u32 1, %s614_s11  }
  0x15   : > { %s386_s26 = sshll.u32 %s711_s25, 4  ;;  %s400_s27 = sshll.u32 %s622_s13, 8 }
  0x16   : > { %s875_s24 = scalar_select %p704_p11, 1, 0 }
  0x17   : > { %s720_s30 = scalar_lea.hbm %s867_s0, %s400_s27  ;;  %s137_s3 = scalar_lea.vmem [#allocation2], %s386_s26 }
  0x18   : > { %s147_s4 = sshll.u32 %s137_s3, 4  ;;  %p728_p0 = pnand %p421_p13, %p687_p4  ;;  %s724_s4 = int_to_ptr.vmem [resolvable:$true] %s147_s4 }
  0x19   : > { %s134_s6 = scalar_lea.sflag [#allocation3], %s711_s25  ;;  %s480_s7 = scalar_lea.hbm %s720_s30, 256 }
  0x1a   : > { %p481_p3 = scmp.ne.s32.totalorder %s720_s30, %s480_s7  ;;  %p482_p5 = pneg %p728_p0 }
  0x1b   : > { %s485_s16 = scalar_lea.hbm %s867_s0, 512  ;;  %p486_p4 = scmp.lt.u32.totalorder %s720_s30, %s867_s0 }
  0x1c   : > { %p483_p6 = pnand %p482_p5, %p481_p3  ;;  %p487_p10 = scmp.lt.u32.totalorder %s485_s16, %s480_s7 }
  0x1d   : > { %p489_p12 = scmp.lt.u32.totalorder %s480_s7, %s720_s30 }
  0x1e   : > { %p484_p7 = pneg %p483_p6  ;;  %p488_p13 = por %p487_p10, %p486_p4 }
  0x20   : > { %p490_p1 = por %p489_p12, %p488_p13 }
  0x22   : > { %p491_p2 = pnand %p490_p1, %p484_p7 }
  0x24   : > { %494 = shalt.err (!%p491_p2)
}
  0x25   : > { %s495_s20 = scalar_lea.vmem %s724_s4, 256  ;;  %s628_s28 = smov [#allocation2]  }
  0x26   : > { %p496_p3 = scmp.ne.s32.totalorder %s724_s4, %s495_s20  ;;  %s500_s29 = sshll.u32 %s628_s28, 4  ;;  %s501_s29 = int_to_ptr.vmem [resolvable:$false] %s500_s29 }
  0x27   : > { %s502_s3 = scalar_lea.vmem %s501_s29, 512  ;;  %p503_p9 = scmp.lt.s32.totalorder %s724_s4, %s501_s29 }
  0x28   : > { %p498_p6 = pnand %p496_p3, %p482_p5  ;;  %p504_p4 = scmp.lt.s32.totalorder %s502_s3, %s495_s20 }
  0x2a   : > { %p499_p11 = pneg %p498_p6  ;;  %p505_p10 = por %p504_p4, %p503_p9 }
  0x2c   : > { %p506_p12 = pnand %p505_p10, %p499_p11 }
  0x2e   : > { %509 = shalt.err (!%p506_p12)
}
  0x2f   : > { %413 = dma.hbm_to_vmem [thread:$0]  (!%p728_p0), %s720_s30, 256, %s724_s4, %s134_s6  }
  0x30   : > { %p877_p1 = scmp.lt.s32.totalorder %s626_s14, 3  ;;  %p878_p2 = scmp.ge.s32.totalorder %s626_s14, 1 }
  0x31   : > { %s773_s16 = scalar_lea.hbm %s868_s1, %s400_s27  ;;  %s158_s18 = scalar_lea.vmem [#allocation5], %s386_s26 }
  0x32   : > { %p764_p7 = pnand %p878_p2, %p877_p1  ;;  %s168_s19 = sshll.u32 %s158_s18, 4  ;;  %s169_s19 = int_to_ptr.vmem [resolvable:$true] %s168_s19 }
  0x33   : > { %s155_s30 = scalar_lea.sflag [#allocation6], %s711_s25  ;;  %s510_s4 = scalar_lea.hbm %s773_s16, 256 }
  0x34   : > { %s879_s7 = scalar_select %p764_p7, 1, 0 }
  0x35   : > { %p511_p9 = scmp.ne.s32.totalorder %s773_s16, %s510_s4  ;;  %s515_s27 = scalar_lea.hbm %s868_s1, 512 }
  0x36   : > { %p516_p3 = scmp.lt.u32.totalorder %s773_s16, %s868_s1  ;;  %p517_p6 = scmp.lt.u32.totalorder %s515_s27, %s510_s4 }
  0x37   : > { %p513_p11 = pnand %p511_p9, %p482_p5  ;;  %p519_p10 = scmp.lt.u32.totalorder %s510_s4, %s773_s16 }
  0x38   : > { %p518_p4 = por %p517_p6, %p516_p3 }
  0x39   : > { %p514_p13 = pneg %p513_p11 }
  0x3a   : > { %p520_p12 = por %p519_p10, %p518_p4 }
  0x3c   : > { %p521_p1 = pnand %p520_p12, %p514_p13 }
  0x3e   : > { %524 = shalt.err (!%p521_p1)
}
  0x3f   : > { %s525_s25 = scalar_lea.vmem %s169_s19, 256  ;;  %s629_s26 = smov [#allocation5]  }
  0x40   : > { %p526_p2 = scmp.ne.s32.totalorder %s169_s19, %s525_s25  ;;  %s530_s3 = sshll.u32 %s629_s26, 4  ;;  %s531_s3 = int_to_ptr.vmem [resolvable:$false] %s530_s3 }
  0x41   : > { %s532_s8 = scalar_lea.vmem %s531_s3, 512  ;;  %p533_p8 = scmp.lt.s32.totalorder %s169_s19, %s531_s3 }
  0x42   : > { %p528_p9 = pnand %p526_p2, %p482_p5  ;;  %p534_p7 = scmp.lt.s32.totalorder %s532_s8, %s525_s25 }
  0x44   : > { %p529_p11 = pneg %p528_p9  ;;  %p535_p3 = por %p534_p7, %p533_p8 }
  0x46   : > { %p536_p6 = pnand %p535_p3, %p529_p11 }
  0x48   : > { %539 = shalt.err (!%p536_p6)
}
  0x49   : > { %416 = dma.hbm_to_vmem [thread:$0]  (!%p728_p0), %s773_s16, 256, %s169_s19, %s155_s30  }
  0x4a   : > { %p880_p13 = scmp.ne.s32.totalorder %s879_s7, 0 }
  0x4b   : > { %s800_s15 = sand.u32 (!%p880_p13), 1, %s610_s10   ;;  %p881_p5 = scmp.ne.s32.totalorder (!%p880_p13), %s873_s21, 0 }
  0x4c   : > { %177 = sbr.rel (%p880_p13) target bundleno = 338 (0x152), region = 28  ;;  %s393_s18 = sshll.u32 (!%p880_p13), %s800_s15, 4 }
  0x4d   : > { %s180_s4 = scalar_lea.sflag (!%p880_p13), [#allocation3], %s800_s15  ;;  %s183_s6 = scalar_lea.vmem (!%p880_p13), [#allocation2], %s393_s18 }
  0x53   : > { %593 = dma.done.wait (%p881_p5), %s180_s4, 256  }
  0x54   : > { %595 = vsyncadd (%p881_p5), %s180_s4, 4294967040  ;;  %s189_s5 = scalar_lea.sflag [#allocation6], %s800_s15  ;;  %s192_s16 = scalar_lea.vmem [#allocation5], %s393_s18 }
  0x55   : > { %597 = dma.done.wait (%p881_p5), %s189_s5, 256  }
  0x56   : > { %599 = vsyncadd (%p881_p5), %s189_s5, 4294967040  ;;  %v220_v0 = vld [vmem:[%s183_s6] sm:$0xff]  ;;  %v221_v1 = vld [vmem:[%s183_s6 + $0x8] sm:$0xff]  ;;  %v249_v22 = vlaneseq  ;;  %s395_s21 = sshll.u32 %s800_s15, 3  ;;  %s397_s7 = sshll.u32 %s618_s12, 7 }
  0x57   : > { %472 = vrcp.f32 %v220_v0  ;;  %v222_v2 = vld [vmem:[%s192_s16] sm:$0xff]  ;;  %v223_v3 = vld [vmem:[%s192_s16 + $0x8] sm:$0xff]  ;;  %s217_s30 = scalar_lea.vmem [#allocation7], %s395_s21  ;;  %s818_s29 = scalar_lea.hbm %s869_s2, %s397_s7 }
  0x58   : > { %474 = vrcp.f32 %v221_v1  ;;  %v250_v23 = vshrl.u32 %v249_v22, 7  ;;  %v252_v24 = vand.u32 127, %v249_v22  ;;  %s275_s20 = sshll.u32 %s217_s30, 4  ;;  %s262_s25 = scalar_lea.sflag [#allocation4], %s800_s15  ;;  %s820_s20 = int_to_ptr.vmem [resolvable:$true] %s275_s20 }
  0x59   : > { %s540_s26 = scalar_lea.vmem %s820_s20, 128  ;;  %p882_p0 = scmp.ne.s32.totalorder %s874_s22, 0 }
  0x5a   : > { %vm254_vm0 = vcmp.eq.s32.totalorder %v250_v23, 0  ;;  %vm255_vm1 = vcmp.eq.s32.totalorder %v252_v24, 0  ;;  %p541_p8 = scmp.ne.s32.totalorder %s820_s20, %s540_s26  ;;  %s630_s12 = smov [#allocation7]  }
  0x5b   : > { %vm256_vm2 = vmand %vm254_vm0, %vm255_vm1  ;;  %s544_s3 = sshll.u32 %s630_s12, 4  ;;  %s545_s3 = int_to_ptr.vmem [resolvable:$false] %s544_s3 }
  0x5c   : > { %p542_p7 = pnand %p541_p8, %p882_p0  ;;  %s546_s8 = scalar_lea.vmem %s545_s3, 256 }
  0x5d   : > { %p547_p10 = scmp.lt.s32.totalorder %s820_s20, %s545_s3  ;;  %p548_p12 = scmp.lt.s32.totalorder %s546_s8, %s540_s26 }
  0x5e   : > { %p543_p4 = pneg %p542_p7 }
  0x5f   : > { %p549_p1 = por %p548_p12, %p547_p10 }
  0x61   : > { %v473_v4 = vpop.eup %472  ;;  %p550_p2 = pnand %p549_p1, %p543_p4 }
  0x62   : > { %v475_v5 = vpop.eup %474  ;;  %v230_v6 = vmul.f32 %v473_v4, %v222_v2 }
  0x63   : > { %v232_v7 = vmul.f32 %v475_v5, %v223_v3 }
  0x64   : > { %476 = vlog2.f32 %v230_v6 }
  0x65   : > { %478 = vlog2.f32 %v232_v7 }
  0x6e   : > { %v477_v8 = vpop.eup %476 }
  0x6f   : > { %v479_v9 = vpop.eup %478  ;;  %v234_v10 = vmul.f32 0.6931472, %v477_v8 }
  0x70   : > { %v236_v11 = vmul.f32 0.6931472, %v479_v9 }
  0x71   : > { %v237_v12 = vmul.f32 %v234_v10, %v222_v2 }
  0x72   : > { %v238_v13 = vmul.f32 %v236_v11, %v223_v3 }
  0x74   : > { %v239_v14 = vadd.f32 %v238_v13, %v237_v12 }
  0x76   : > { %240 = vadd.xlane.f32.xlu0 %v239_v14 }
 0x103   : > { %v241_v15 = vpop.xlane.xlu0 %240 }
 0x104   : > { %v242_v16 = vrot.slane %v241_v15, 4 }
 0x106   : > { %v243_v17 = vadd.f32 %v242_v16, %v241_v15 }
 0x108   : > { %v244_v18 = vrot.slane %v243_v17, 2 }
 0x10a   : > { %v245_v19 = vadd.f32 %v244_v18, %v243_v17 }
 0x10c   : > { %v246_v20 = vrot.slane %v245_v19, 1 }
 0x10e   : > { %v247_v21 = vadd.f32 %v246_v20, %v245_v19 }
 0x110   : > { %402 = vpush %v247_v21 }
 0x141   : > { %s403_s19 = spop %402 }
 0x142   : > { %v257_v25 = vstv %s403_s19 }
 0x143   : > { %v258_v26 = vsel %vm256_vm2, %v257_v25, 0.0 }
 0x144   : > { %260 = vst [vmem:[%s217_s30] sm:$0xff] %v258_v26 }
 0x145   : > { %553 = shalt.err (!%p550_p2)
}
 0x146   : > { %s554_s15 = scalar_lea.hbm %s818_s29, 128  ;;  %s558_s6 = scalar_lea.hbm %s869_s2, 256 }
 0x147   : > { %p555_p9 = scmp.ne.s32.totalorder %s818_s29, %s554_s15  ;;  %p559_p6 = scmp.lt.u32.totalorder %s818_s29, %s869_s2 }
 0x148   : > { %p560_p13 = scmp.lt.u32.totalorder %s558_s6, %s554_s15  ;;  %p562_p8 = scmp.lt.u32.totalorder %s554_s15, %s818_s29 }
 0x149   : > { %p556_p11 = pnand %p555_p9, %p882_p0 }
 0x14a   : > { %p561_p5 = por %p560_p13, %p559_p6 }
 0x14b   : > { %p557_p3 = pneg %p556_p11 }
 0x14c   : > { %p563_p7 = por %p562_p8, %p561_p5 }
 0x14e   : > { %p564_p4 = pnand %p563_p7, %p557_p3 }
 0x150   : > { %567 = shalt.err (!%p564_p4)
}
 0x151   : > { %408 = dma.vmem_to_hbm [thread:$0]  (%p882_p0), %s820_s20, 128, %s818_s29, %s262_s25  }
 0x152 PF: > { %s287_s21 = sand.u32 1, %s606_s9   ;;  %p883_p10 = scmp.ne.s32.totalorder %s875_s24, 0 }
 0x153   : > { %p884_p12 = scmp.ge.s32.totalorder %s626_s14, 2  ;;  %s288_s7 = scalar_lea.sflag [#allocation4], %s287_s21 }
 0x155   : > { %p418_p1 = pnand %p884_p12, %p883_p10 }
 0x157   : > { %601 = dma.done.wait (!%p418_p1), %s288_s7, 128  }
 0x158   : > { %603 = vsyncadd (!%p418_p1), %s288_s7, 4294967168  ;;  %s21_s14 = sadd.s32 1, %s626_s14   ;;  %s885_s9 = smov %s610_s10 }
 0x159   : > { %p18_p2 = scmp.ge.s32.totalorder %s21_s14, 4   ;;  %s886_s10 = smov %s614_s11 }
 0x15a   : > { %s887_s11 = smov %s702_s23  ;;  %s888_s12 = smov %s622_s13 }
 0x15b   : > { %s889_s13 = smov %s891_s17  ;;  %20 = sbr.rel (!%p18_p2) target bundleno = 8 (0x8), region = 90 }
 0x162   :  { %293 = vsyncpa [#allocation3], 1 }
 0x163   :  { %295 = vsyncpa [#allocation3 + $0x1], 1 }
 0x164   :  { %296 = vsyncpa [#allocation6], 1 }
 0x165   :  { %298 = vsyncpa [#allocation6 + $0x1], 1 }
 0x166   :  { %299 = vsyncpa [#allocation4], 1 }
 0x167   :  { %301 = vsyncpa [#allocation4 + $0x1], 1 }

</bundles_post_ra>
